<compile_context>
chip_gen: v5e
topology: v5e:2x2
jax: 0.10.0
libtpu: 0.0.40
codegen_flags: <defaults>
</compile_context>

<pallas_src>
import functools

import jax
import jax.numpy as jnp
from jax import lax
from jax.experimental import pallas as pl
from jax.experimental.pallas import tpu as pltpu


def _round_up(n, m):
    return ((n + m - 1) // m) * m


def _res_ln_kernel(*refs, p, eps, inv_d, training, packed):
    """One tile of (packed) rows: y = LN(dropout(x) + residual) * gamma + beta."""
    o_ref = refs[-1]
    it = iter(refs[:-1])
    x_ref = next(it)
    r_ref = next(it)
    u_ref = next(it) if training else None
    g_ref = next(it)
    b_ref = next(it)
    m_ref = next(it) if packed else None

    x = x_ref[...].astype(jnp.float32)
    r = r_ref[...].astype(jnp.float32)

    if training:
        # Inverted-scaling dropout; keep-probability 1 - p, zeros elsewhere.
        keep = u_ref[...] >= p
        x = jnp.where(keep, x * (1.0 / (1.0 - p)), 0.0)

    h = x + r

    if packed:
        # Segmented per-row sums via block-diagonal ones matrix on the MXU.
        # HIGHEST precision keeps the contraction at f32 accuracy.
        m = m_ref[...]
        sum_h = jnp.dot(h, m, preferred_element_type=jnp.float32,
                        precision=lax.Precision.HIGHEST)
        sum_h2 = jnp.dot(h * h, m, preferred_element_type=jnp.float32,
                         precision=lax.Precision.HIGHEST)
        mean = sum_h * inv_d
        var = sum_h2 * inv_d - mean * mean          # single-pass variance
    else:
        mean = jnp.mean(h, axis=-1, keepdims=True)
        var = jnp.mean(h * h, axis=-1, keepdims=True) - mean * mean

    inv = lax.rsqrt(var + eps)
    scale = inv * g_ref[...]                        # fold gamma into 1/std
    shift = b_ref[...] - mean * scale
    o_ref[...] = (h * scale + shift).astype(o_ref.dtype)


def residual_layer_norm(x, residual, gamma, beta, *, p=0.3, eps=1e-5,
                        training=False, rng_key=None, max_tile_rows=2048):
    """Pallas implementation of ResidualLayerNorm.forward(x, residual)."""
    B, S, D = x.shape
    N = B * S

    # Lane-dense repack factor: G logical rows of width D per 128-lane row.
    packed = (D < 128) and (128 % D == 0)
    G = 128 // D if packed else 1
    L = G * D

    inputs = [x.reshape(N, D), residual.reshape(N, D)]
    use_dropout = bool(training) and p > 0.0
    if use_dropout:
        key = rng_key if rng_key is not None else jax.random.PRNGKey(0)
        # TODO(synk): dropout matches PyTorch in distribution only (JAX RNG stream).
        inputs.append(jax.random.uniform(key, (N, D), dtype=jnp.float32))

    # Pad rows so they (a) pack evenly into L-lane rows and (b) divide the tile.
    R = -(-N // G)                                   # packed rows needed
    tile = min(max_tile_rows, _round_up(R, 8))       # tiny inputs -> single step
    Rpad = _round_up(R, tile)
    pad_rows = Rpad * G - N
    if pad_rows:
        inputs = [jnp.pad(a, ((0, pad_rows), (0, 0))) for a in inputs]
    inputs = [a.reshape(Rpad, L) for a in inputs]

    gamma_row = jnp.tile(gamma.reshape(1, D).astype(jnp.float32), (1, G))
    beta_row = jnp.tile(beta.reshape(1, D).astype(jnp.float32), (1, G))
    inputs += [gamma_row, beta_row]

    row_spec = pl.BlockSpec((tile, L), lambda i: (i, 0))
    const_spec = pl.BlockSpec((1, L), lambda i: (0, 0))
    in_specs = [row_spec, row_spec]
    if use_dropout:
        in_specs.append(row_spec)
    in_specs += [const_spec, const_spec]

    if packed:
        lane = jnp.arange(L)
        blockdiag = (lane[:, None] // D == lane[None, :] // D).astype(jnp.float32)
        inputs.append(blockdiag)
        in_specs.append(pl.BlockSpec((L, L), lambda i: (0, 0)))

    kernel = functools.partial(_res_ln_kernel, p=p, eps=eps, inv_d=1.0 / D,
                               training=use_dropout, packed=packed)

    out = pl.pallas_call(
        kernel,
        out_shape=jax.ShapeDtypeStruct((Rpad, L), x.dtype),
        grid=(Rpad // tile,),
        in_specs=in_specs,
        out_specs=row_spec,
        compiler_params=pltpu.CompilerParams(
            dimension_semantics=("parallel",)),
    )(*inputs)

    return out.reshape(Rpad * G, D)[:N].reshape(B, S, D)


if __name__ == "__main__":
    # Module config: d_model = 32, dropout p = 0.3 (identity in eval mode).
    batch, seq, d_model = 2, 8, 32

    key = jax.random.PRNGKey(0)
    kx, kr, kd = jax.random.split(key, 3)
    x = jax.random.normal(kx, (batch, seq, d_model), dtype=jnp.float32)
    residual = jax.random.normal(kr, (batch, seq, d_model), dtype=jnp.float32)

    # nn.LayerNorm(d_model) init: weight = ones, bias = zeros (deterministic).
    gamma = jnp.ones((d_model,), jnp.float32)
    beta = jnp.zeros((d_model,), jnp.float32)

    # Eval-mode forward (dropout is identity, matching PyTorch .eval()).
    out = residual_layer_norm(x, residual, gamma, beta, p=0.3, training=False)
    out = jax.block_until_ready(out)

    # Pure-JAX reference for correctness.
    h = x + residual
    mean = jnp.mean(h, axis=-1, keepdims=True)
    var = jnp.mean((h - mean) ** 2, axis=-1, keepdims=True)
    ref = (h - mean) * lax.rsqrt(var + 1e-5) * gamma + beta
    assert out.shape == ref.shape
    assert jnp.allclose(out, ref, atol=2e-5, rtol=2e-5), "mismatch vs reference"

    # Training-mode forward (dropout mask from JAX RNG; distribution-level match).
    out_train = residual_layer_norm(x, residual, gamma, beta, p=0.3,
                                    training=True, rng_key=kd)
    out_train = jax.block_until_ready(out_train)
    assert bool(jnp.all(jnp.isfinite(out_train)))

    print("KERNEL_OK")
</pallas_src>

<mosaic_0001>
module attributes {stable_mosaic.version = 11 : i64} {
  func.func @_res_ln_kernel(%arg0: i32, %arg1: memref<8x128xf32, #tpu.memory_space<vmem>>, %arg2: memref<8x128xf32, #tpu.memory_space<vmem>>, %arg3: memref<1x128xf32, #tpu.memory_space<vmem>>, %arg4: memref<1x128xf32, #tpu.memory_space<vmem>>, %arg5: memref<128x128xf32, #tpu.memory_space<vmem>>, %arg6: memref<8x128xf32, #tpu.memory_space<vmem>>) attributes {dimension_semantics = [#tpu.dimension_semantics<parallel>], iteration_bounds = array<i64: 1>, scalar_prefetch = 0 : i64, scratch_operands = 0 : i64, tpu.core_type = #tpu.core_type<tc>, window_params = [{transform_indices = @transform_0, window_bounds = array<i64: 8, 128>}, {transform_indices = @transform_1, window_bounds = array<i64: 8, 128>}, {pipeline_mode = #tpu.pipeline_mode<synchronous>, transform_indices = @transform_2, window_bounds = array<i64: 1, 128>}, {pipeline_mode = #tpu.pipeline_mode<synchronous>, transform_indices = @transform_3, window_bounds = array<i64: 1, 128>}, {pipeline_mode = #tpu.pipeline_mode<synchronous>, transform_indices = @transform_4, window_bounds = array<i64: 128, 128>}, {transform_indices = @transform_5, window_bounds = array<i64: 8, 128>}]} {
    %c0 = arith.constant 0 : index
    %c0_0 = arith.constant 0 : index
    %0 = vector.load %arg1[%c0, %c0_0] : memref<8x128xf32, #tpu.memory_space<vmem>>, vector<8x128xf32>
    %c0_1 = arith.constant 0 : index
    %c0_2 = arith.constant 0 : index
    %1 = vector.load %arg2[%c0_1, %c0_2] : memref<8x128xf32, #tpu.memory_space<vmem>>, vector<8x128xf32>
    %2 = arith.addf %0, %1 : vector<8x128xf32>
    %c0_3 = arith.constant 0 : index
    %c0_4 = arith.constant 0 : index
    %3 = vector.load %arg5[%c0_3, %c0_4] : memref<128x128xf32, #tpu.memory_space<vmem>>, vector<128x128xf32>
    %cst = arith.constant dense<0.000000e+00> : vector<8x128xf32>
    %4 = tpu.matmul %2, %3, %cst {dimension_numbers = #tpu.dot_dimension_numbers<[1], [0], [0], [1], [0, 0, 1, 1], [], []>, precision = #tpu.contract_precision<fp32>} : vector<8x128xf32>, vector<128x128xf32>, vector<8x128xf32> -> vector<8x128xf32>
    %5 = arith.mulf %2, %2 : vector<8x128xf32>
    %cst_5 = arith.constant dense<0.000000e+00> : vector<8x128xf32>
    %6 = tpu.matmul %5, %3, %cst_5 {dimension_numbers = #tpu.dot_dimension_numbers<[1], [0], [0], [1], [0, 0, 1, 1], [], []>, precision = #tpu.contract_precision<fp32>} : vector<8x128xf32>, vector<128x128xf32>, vector<8x128xf32> -> vector<8x128xf32>
    %cst_6 = arith.constant 3.125000e-02 : f32
    %7 = vector.broadcast %cst_6 : f32 to vector<8x128xf32>
    %8 = arith.mulf %4, %7 : vector<8x128xf32>
    %cst_7 = arith.constant 3.125000e-02 : f32
    %9 = vector.broadcast %cst_7 : f32 to vector<8x128xf32>
    %10 = arith.mulf %6, %9 : vector<8x128xf32>
    %11 = arith.mulf %8, %8 : vector<8x128xf32>
    %12 = arith.subf %10, %11 : vector<8x128xf32>
    %cst_8 = arith.constant 9.99999974E-6 : f32
    %13 = vector.broadcast %cst_8 : f32 to vector<8x128xf32>
    %14 = arith.addf %12, %13 : vector<8x128xf32>
    %15 = math.rsqrt %14 : vector<8x128xf32>
    %c0_9 = arith.constant 0 : index
    %c0_10 = arith.constant 0 : index
    %16 = vector.load %arg3[%c0_9, %c0_10] : memref<1x128xf32, #tpu.memory_space<vmem>>, vector<1x128xf32>
    %17 = vector.broadcast %16 : vector<1x128xf32> to vector<8x128xf32>
    %18 = arith.mulf %15, %17 : vector<8x128xf32>
    %c0_11 = arith.constant 0 : index
    %c0_12 = arith.constant 0 : index
    %19 = vector.load %arg4[%c0_11, %c0_12] : memref<1x128xf32, #tpu.memory_space<vmem>>, vector<1x128xf32>
    %20 = arith.mulf %8, %18 : vector<8x128xf32>
    %21 = vector.broadcast %19 : vector<1x128xf32> to vector<8x128xf32>
    %22 = arith.subf %21, %20 : vector<8x128xf32>
    %23 = arith.mulf %2, %18 : vector<8x128xf32>
    %24 = arith.addf %23, %22 : vector<8x128xf32>
    %c0_13 = arith.constant 0 : index
    %c0_14 = arith.constant 0 : index
    %25 = vector.load %arg6[%c0_13, %c0_14] : memref<8x128xf32, #tpu.memory_space<vmem>>, vector<8x128xf32>
    tpu.vector_store %arg6[%c0_13, %c0_14], %24 {strides = array<i32>} : memref<8x128xf32, #tpu.memory_space<vmem>>, vector<8x128xf32>,
    return
  }
  func.func @transform_0(%arg0: i32) -> (i32, i32) {
    %c0_i32 = arith.constant 0 : i32
    %c0_i32_0 = arith.constant 0 : i32
    return %arg0, %c0_i32 : i32, i32
  }
  func.func @transform_1(%arg0: i32) -> (i32, i32) {
    %c0_i32 = arith.constant 0 : i32
    %c0_i32_0 = arith.constant 0 : i32
    return %arg0, %c0_i32 : i32, i32
  }
  func.func @transform_2(%arg0: i32) -> (i32, i32) {
    %c0_i32 = arith.constant 0 : i32
    %c0_i32_0 = arith.constant 0 : i32
    %c0_i32_1 = arith.constant 0 : i32
    return %c0_i32, %c0_i32_0 : i32, i32
  }
  func.func @transform_3(%arg0: i32) -> (i32, i32) {
    %c0_i32 = arith.constant 0 : i32
    %c0_i32_0 = arith.constant 0 : i32
    %c0_i32_1 = arith.constant 0 : i32
    return %c0_i32, %c0_i32_0 : i32, i32
  }
  func.func @transform_4(%arg0: i32) -> (i32, i32) {
    %c0_i32 = arith.constant 0 : i32
    %c0_i32_0 = arith.constant 0 : i32
    %c0_i32_1 = arith.constant 0 : i32
    return %c0_i32, %c0_i32_0 : i32, i32
  }
  func.func @transform_5(%arg0: i32) -> (i32, i32) {
    %c0_i32 = arith.constant 0 : i32
    %c0_i32_0 = arith.constant 0 : i32
    return %arg0, %c0_i32 : i32, i32
  }
}

</mosaic_0001>

<bundles_post_ra>
// kernel: tpu_custom_call.1
= control target key start
LH: loop header
LB: loop body
LE: loop exit
PB: predicated region body
PF: predicated region fallthrough
CT: control target
= control target key end

     0   :  { %10 = vsyncpa [#allocation3], 0  ;;  %s1382_s0 = inlined_call_operand.hbm [shape: f32[8,128], index: 0, kind: input, shape index: {}]   ;;  %s1383_s1 = inlined_call_operand.hbm [shape: f32[8,128], index: 1, kind: input, shape index: {}]   ;;  %s1384_s2 = inlined_call_operand.vmem [shape: f32[1,128], index: 2, kind: input, shape index: {}]   ;;  %s1385_s3 = inlined_call_operand.vmem [shape: f32[1,128], index: 3, kind: input, shape index: {}]   ;;  %s1386_s4 = inlined_call_operand.hbm [shape: f32[128,128], index: 4, kind: input, shape index: {}]   ;;  %s1387_s5 = inlined_call_operand.hbm [shape: f32[8,128], index: 5, kind: output, shape index: {}]  }
   0x1   :  { %11 = vsyncpa [#allocation6], 0  ;;  %s29_s20 = sshll.u32 %s1383_s1, 4  ;;  %s30_s20 = int_to_ptr.hbm [resolvable:$true] %s29_s20 }
   0x2   :  { %12 = vsyncpa [#allocation4], 0  ;;  %s925_s21 = smov [#allocation5]   ;;  %s18_s25 = sshll.u32 %s1382_s0, 4  ;;  %s19_s25 = int_to_ptr.hbm [resolvable:$true] %s18_s25 }
   0x3   :  { %s31_s22 = sshll.u32 %s925_s21, 4  ;;  %s926_s26 = smov [#allocation2]   ;;  %s32_s22 = int_to_ptr.vmem [resolvable:$true] %s31_s22 }
   0x4   :  { %34 = dma.hbm_to_vmem [thread:$0]  %s30_s20, 128, %s32_s22, [#allocation6]  }
   0x5   :  { %s20_s27 = sshll.u32 %s926_s26, 4  ;;  %s43_s30 = sshll.u32 %s1386_s4, 4  ;;  %s21_s27 = int_to_ptr.vmem [resolvable:$true] %s20_s27  ;;  %s44_s30 = int_to_ptr.hbm [resolvable:$true] %s43_s30 }
   0x6   :  { %23 = dma.hbm_to_vmem [thread:$0]  %s19_s25, 128, %s21_s27, [#allocation3]  }
   0x7   :  { %s927_s1 = smov [#allocation7]   ;;  %s928_s7 = smov 128  }
   0x8   :  { %s45_s6 = sshll.u32 %s927_s1, 4  ;;  %s929_s8 = smov 8   ;;  %s46_s6 = int_to_ptr.vmem [resolvable:$true] %s45_s6 }
   0x9   :  { %51 = dma.hbm_to_vmem [thread:$0]  %s44_s30, 2048, %s46_s6, [#allocation6], %s928_s7, %s928_s7, %s929_s8  }
   0xa   :  { %919 = dma.done.wait [#allocation3], 128  }
   0xb   :  { %920 = vsyncadd [#allocation3], 4294967168 }
   0xc   :  { %921 = dma.done.wait [#allocation6], 2176  }
   0xd   :  { %922 = vsyncadd [#allocation6], 4294965120  ;;  %v82_v0 = vld [vmem:[#allocation7 + $0x78] sm:$0xff]  ;;  %v81_v1 = vld [vmem:[#allocation7 + $0x70] sm:$0xff]  ;;  %s930_s11 = smov [#allocation8]   ;;  %s802_s15 = sshll.u32 %s1387_s5, 4  ;;  %s803_s15 = int_to_ptr.hbm [resolvable:$true] %s802_s15 }
   0xe   :  { %v80_v2 = vld [vmem:[#allocation7 + $0x68] sm:$0xff]  ;;  %v970_v3 = vand.u32 4294901760, %v82_v0  ;;  %v972_v4 = vand.u32 4294901760, %v81_v1  ;;  %v79_v6 = vld [vmem:[#allocation7 + $0x60] sm:$0xff]  ;;  %v78_v7 = vld [vmem:[#allocation7 + $0x58] sm:$0xff]  ;;  %s800_s12 = sshll.u32 %s930_s11, 4  ;;  %s801_s12 = int_to_ptr.vmem [resolvable:$true] %s800_s12 }
   0xf   :  { %v974_v5 = vand.u32 4294901760, %v80_v2  ;;  %v77_v8 = vld [vmem:[#allocation7 + $0x50] sm:$0xff]  ;;  %v976_v9 = vand.u32 4294901760, %v79_v6  ;;  %v978_v10 = vand.u32 4294901760, %v78_v7  ;;  %v76_v12 = vld [vmem:[#allocation7 + $0x48] sm:$0xff]  ;;  %v75_v13 = vld [vmem:[#allocation7 + $0x40] sm:$0xff] }
  0x10   :  { %v980_v11 = vand.u32 4294901760, %v77_v8  ;;  %84 = vmatpush.msra.mxu0 %v970_v3  ;;  %v984_v14 = vsub.f32 %v82_v0, %v970_v3  ;;  %v987_v15 = vsub.f32 %v81_v1, %v972_v4  ;;  %280 = vmatpush.msra.mxu3 %v970_v3  ;;  %v993_v17 = vand.u32 4294901760, %v76_v12  ;;  %v74_v21 = vld [vmem:[#allocation7 + $0x38] sm:$0xff]  ;;  %v73_v34 = vld [vmem:[#allocation7 + $0x30] sm:$0xff]  ;;  %v72_v35 = vld [vmem:[#allocation7 + $0x28] sm:$0xff] }
  0x11   :  { %v991_v16 = vsub.f32 %v80_v2, %v974_v5  ;;  %v996_v18 = vsub.f32 %v79_v6, %v976_v9  ;;  %v999_v19 = vsub.f32 %v78_v7, %v978_v10  ;;  %v1015_v25 = vand.u32 4294901760, %v75_v13  ;;  %v71_v42 = vld [vmem:[#allocation7 + $0x20] sm:$0xff]  ;;  %v70_v48 = vld [vmem:[#allocation7 + $0x18] sm:$0xff]  ;;  %v69_v54 = vld [vmem:[#allocation7 + $0x10] sm:$0xff] }
  0x12   :  { %v1002_v20 = vsub.f32 %v77_v8, %v980_v11  ;;  %227 = vmatpush.msra.mxu2 %v984_v14  ;;  %86 = vmatpush.msra.mxu0 %v972_v4  ;;  %v1007_v22 = vand.u32 4294901760, %v984_v14  ;;  %v1010_v23 = vand.u32 4294901760, %v987_v15  ;;  %v1025_v28 = vsub.f32 %v76_v12, %v993_v17  ;;  %v68_v60 = vld [vmem:[#allocation7 + $0x8] sm:$0xff]  ;;  %v67_v1 = vld [vmem:[#allocation7] sm:$0xff] }
  0x13   :  { %v1013_v24 = vand.u32 4294901760, %v991_v16  ;;  %282 = vmatpush.msra.mxu3 %v972_v4  ;;  %v1019_v26 = vand.u32 4294901760, %v996_v18  ;;  %v1022_v27 = vand.u32 4294901760, %v999_v19  ;;  %v1035_v32 = vand.u32 4294901760, %v74_v21 }
  0x14   :  { %230 = vmatpush.msra.mxu2 %v987_v15  ;;  %88 = vmatpush.msra.mxu0 %v974_v5  ;;  %v127_v29 = vsub.f32 %v984_v14, %v1007_v22  ;;  %v133_v30 = vsub.f32 %v987_v15, %v1010_v23  ;;  %v1039_v33 = vand.u32 4294901760, %v1002_v20  ;;  %v1050_v39 = vsub.f32 %v75_v13, %v1015_v25 }
  0x15   :  { %v139_v31 = vsub.f32 %v991_v16, %v1013_v24  ;;  %284 = vmatpush.msra.mxu3 %v974_v5  ;;  %v145_v38 = vsub.f32 %v996_v18, %v1019_v26  ;;  %v151_v40 = vsub.f32 %v999_v19, %v1022_v27  ;;  %v1056_v41 = vand.u32 4294901760, %v1025_v28 }
  0x16   :  { %v1041_v36 = vand.u32 4294901760, %v127_v29  ;;  %233 = vmatpush.msra.mxu2 %v991_v16  ;;  %90 = vmatpush.msra.mxu0 %v976_v9  ;;  %v1045_v37 = vand.u32 4294901760, %v133_v30  ;;  %v1063_v44 = vsub.f32 %v74_v21, %v1035_v32  ;;  %v1065_v45 = vand.u32 4294901760, %v73_v34 }
  0x17   :  { %286 = vmatpush.msra.mxu3 %v976_v9  ;;  %v1060_v43 = vand.u32 4294901760, %v139_v31  ;;  %v1067_v46 = vand.u32 4294901760, %v72_v35  ;;  %v157_v47 = vsub.f32 %v1002_v20, %v1039_v33  ;;  %v1075_v49 = vand.u32 4294901760, %v145_v38 }
  0x18   :  { %129 = vmatpush.msra.mxu1 %v1041_v36  ;;  %236 = vmatpush.msra.mxu2 %v996_v18  ;;  %v1078_v50 = vand.u32 4294901760, %v1050_v39  ;;  %v1081_v51 = vsub.f32 %v73_v34, %v1065_v45  ;;  %v1083_v52 = vand.u32 4294901760, %v71_v42  ;;  %v163_v53 = vsub.f32 %v1025_v28, %v1056_v41 }
  0x19   :  { %92 = vmatpush.msra.mxu0 %v978_v10  ;;  %288 = vmatpush.msra.mxu3 %v978_v10  ;;  %v1091_v55 = vand.u32 4294901760, %v151_v40  ;;  %v1094_v56 = vand.u32 4294901760, %v1063_v44  ;;  %v1097_v57 = vsub.f32 %v72_v35, %v1067_v46  ;;  %v1099_v58 = vand.u32 4294901760, %v70_v48 }
  0x1a   :  { %135 = vmatpush.msra.mxu1 %v1045_v37  ;;  %239 = vmatpush.msra.mxu2 %v999_v19  ;;  %v1102_v59 = vand.u32 4294901760, %v157_v47  ;;  %v169_v61 = vsub.f32 %v1050_v39, %v1078_v50  ;;  %v1110_v62 = vand.u32 4294901760, %v1081_v51  ;;  %v1113_v63 = vsub.f32 %v71_v42, %v1083_v52 }
  0x1b   :  { %94 = vmatpush.msra.mxu0 %v980_v11  ;;  %290 = vmatpush.msra.mxu3 %v980_v11  ;;  %v1115_v0 = vand.u32 4294901760, %v69_v54  ;;  %v1118_v2 = vand.u32 4294901760, %v163_v53  ;;  %v175_v6 = vsub.f32 %v1063_v44, %v1094_v56  ;;  %v1126_v7 = vand.u32 4294901760, %v1097_v57 }
  0x1c   :  { %141 = vmatpush.msra.mxu1 %v1060_v43  ;;  %242 = vmatpush.msra.mxu2 %v1002_v20  ;;  %1390 = vst [vmem:[#allocation12_spill] sm:$0xff] %v1113_v63  ;;  %v1129_v8 = vsub.f32 %v70_v48, %v1099_v58  ;;  %v1131_v12 = vand.u32 4294901760, %v68_v60  ;;  %v1135_v13 = vand.u32 4294901760, %v67_v1  ;;  %v1139_v21 = vand.u32 4294901760, %v169_v61 }
  0x1d   :  { %96 = vmatpush.msra.mxu0 %v993_v17  ;;  %292 = vmatpush.msra.mxu3 %v993_v17  ;;  %v181_v29 = vsub.f32 %v1081_v51, %v1110_v62  ;;  %v1144_v30 = vand.u32 4294901760, %v1113_v63  ;;  %v1147_v31 = vsub.f32 %v69_v54, %v1115_v0  ;;  %v1153_v34 = vand.u32 4294901760, %v175_v6 }
  0x1e   :  { %147 = vmatpush.msra.mxu1 %v1075_v49  ;;  %245 = vmatpush.msra.mxu2 %v1025_v28  ;;  %1391 = vst [vmem:[#allocation13_spill] sm:$0xff] %v1129_v8  ;;  %v187_v35 = vsub.f32 %v1097_v57, %v1126_v7  ;;  %v1158_v38 = vand.u32 4294901760, %v1129_v8  ;;  %v1161_v40 = vsub.f32 %v68_v60, %v1131_v12 }
  0x1f   :  { %98 = vmatpush.msra.mxu0 %v1015_v25  ;;  %294 = vmatpush.msra.mxu3 %v1015_v25  ;;  %v1167_v42 = vand.u32 4294901760, %v181_v29  ;;  %v193_v47 = vsub.f32 %v1113_v63, %v1144_v30  ;;  %v1172_v48 = vand.u32 4294901760, %v1147_v31  ;;  %v1175_v53 = vsub.f32 %v67_v1, %v1135_v13 }
  0x20   :  { %153 = vmatpush.msra.mxu1 %v1091_v55  ;;  %248 = vmatpush.msra.mxu2 %v1050_v39  ;;  %v1181_v54 = vand.u32 4294901760, %v187_v35  ;;  %v199_v60 = vsub.f32 %v1129_v8, %v1158_v38  ;;  %v1186_v61 = vand.u32 4294901760, %v1161_v40 }
  0x21   :  { %100 = vmatpush.msra.mxu0 %v1035_v32  ;;  %296 = vmatpush.msra.mxu3 %v1035_v32  ;;  %v1192_v1 = vand.u32 4294901760, %v193_v47  ;;  %v205_v6 = vsub.f32 %v1147_v31, %v1172_v48  ;;  %v1197_v29 = vand.u32 4294901760, %v1175_v53 }
  0x22   :  { %159 = vmatpush.msra.mxu1 %v1102_v59  ;;  %251 = vmatpush.msra.mxu2 %v1063_v44  ;;  %v1203_v35 = vand.u32 4294901760, %v199_v60  ;;  %v211_v47 = vsub.f32 %v1161_v40, %v1186_v61 }
  0x23   :  { %102 = vmatpush.msra.mxu0 %v1065_v45  ;;  %298 = vmatpush.msra.mxu3 %v1065_v45 }
  0x24   :  { %165 = vmatpush.msra.mxu1 %v1118_v2  ;;  %254 = vmatpush.msra.mxu2 %v1081_v51  ;;  %v1219_v60 = vand.u32 4294901760, %v211_v47  ;;  %v64_v47 = vld [vmem:[#allocation2] sm:$0xff] }
  0x25   :  { %104 = vmatpush.msra.mxu0 %v1067_v46  ;;  %300 = vmatpush.msra.mxu3 %v1067_v46 }
  0x26   :  { %171 = vmatpush.msra.mxu1 %v1139_v21  ;;  %257 = vmatpush.msra.mxu2 %v1097_v57 }
  0x27   :  { %106 = vmatpush.msra.mxu0 %v1083_v52  ;;  %302 = vmatpush.msra.mxu3 %v1083_v52 }
  0x28   :  { %177 = vmatpush.msra.mxu1 %v1153_v34  ;;  %260 = vmatpush.msra.mxu2 %v1113_v63  ;;  %v217_v63 = vsub.f32 %v1175_v53, %v1197_v29 }
  0x29   :  { %108 = vmatpush.msra.mxu0 %v1099_v58  ;;  %304 = vmatpush.msra.mxu3 %v1099_v58 }
  0x2a   :  { %183 = vmatpush.msra.mxu1 %v1167_v42  ;;  %263 = vmatpush.msra.mxu2 %v1129_v8  ;;  %v1211_v8 = vand.u32 4294901760, %v205_v6  ;;  %v1225_v6 = vand.u32 4294901760, %v217_v63 }
  0x2b   :  { %110 = vmatpush.msra.mxu0 %v1115_v0  ;;  %306 = vmatpush.msra.mxu3 %v1115_v0 }
  0x2c   :  { %189 = vmatpush.msra.mxu1 %v1181_v54  ;;  %266 = vmatpush.msra.mxu2 %v1147_v31 }
  0x2d   :  { %112 = vmatpush.msra.mxu0 %v1131_v12  ;;  %308 = vmatpush.msra.mxu3 %v1131_v12 }
  0x2e   :  { %195 = vmatpush.msra.mxu1 %v1192_v1  ;;  %269 = vmatpush.msra.mxu2 %v1161_v40 }
  0x2f   :  { %114 = vmatpush.msra.mxu0 %v1135_v13  ;;  %310 = vmatpush.msra.mxu3 %v1135_v13 }
  0x30   :  { %201 = vmatpush.msra.mxu1 %v1203_v35  ;;  %272 = vmatpush.msra.mxu2 %v1175_v53 }
  0x31   :  { %321 = vmatpush.msrb.mxu0 %v1007_v22  ;;  %471 = vmatpush.msrb.mxu3 %v1041_v36  ;;  %v65_v36 = vld [vmem:[#allocation5] sm:$0xff] }
  0x32   :  { %426 = vmatpush.msrb.mxu2 %v970_v3  ;;  %207 = vmatpush.msra.mxu1 %v1211_v8 }
  0x33   :  { %325 = vmatpush.msrb.mxu0 %v1010_v23  ;;  %477 = vmatpush.msrb.mxu3 %v1045_v37  ;;  %v1241_v37 = vadd.f32 %v65_v36, %v64_v47 }
  0x34   :  { %428 = vmatpush.msrb.mxu2 %v972_v4  ;;  %213 = vmatpush.msra.mxu1 %v1219_v60 }
  0x35   :  { %329 = vmatpush.msrb.mxu0 %v1013_v24  ;;  %483 = vmatpush.msrb.mxu3 %v1060_v43  ;;  %v1252_v43 = vand.u32 4294901760, %v1241_v37 }
  0x36   :  { %430 = vmatpush.msrb.mxu2 %v974_v5  ;;  %219 = vmatpush.msra.mxu1 %v1225_v6 }
  0x37   :  { %333 = vmatpush.msrb.mxu0 %v1019_v26  ;;  %489 = vmatpush.msrb.mxu3 %v1075_v49  ;;  %v116_v49 = vsub.f32 %v1241_v37, %v1252_v43 }
  0x38   :  { %388 = vmatpush.msrb.mxu1 %v970_v3  ;;  %432 = vmatpush.msrb.mxu2 %v976_v9 }
  0x39   :  { %337 = vmatpush.msrb.mxu0 %v1022_v27  ;;  %495 = vmatpush.msrb.mxu3 %v1091_v55  ;;  %v117_v55 = vand.u32 4294901760, %v116_v49 }
  0x3a   :  { %390 = vmatpush.msrb.mxu1 %v972_v4  ;;  %434 = vmatpush.msrb.mxu2 %v978_v10 }
  0x3b   :  { %341 = vmatpush.msrb.mxu0 %v1039_v33  ;;  %501 = vmatpush.msrb.mxu3 %v1102_v59  ;;  %v118_v59 = vsub.f32 %v116_v49, %v117_v55 }
  0x3c   :  { %392 = vmatpush.msrb.mxu1 %v974_v5  ;;  %436 = vmatpush.msrb.mxu2 %v980_v11 }
  0x3d   :  { %345 = vmatpush.msrb.mxu0 %v1056_v41  ;;  %507 = vmatpush.msrb.mxu3 %v1118_v2  ;;  %v119_v63 = vand.u32 4294901760, %v118_v59  ;;  %v424_v2 = vmul.f32 %v1241_v37, %v1241_v37 }
  0x3e   :  { %394 = vmatpush.msrb.mxu1 %v976_v9  ;;  %438 = vmatpush.msrb.mxu2 %v993_v17 }
  0x3f   :  { %349 = vmatpush.msrb.mxu0 %v1078_v50  ;;  %513 = vmatpush.msrb.mxu3 %v1139_v21  ;;  %v819_v21 = vld [vmem:[%s1384_s2] ss:$0 sm:$0xff] }
  0x40   :  { %396 = vmatpush.msrb.mxu1 %v978_v10  ;;  %440 = vmatpush.msrb.mxu2 %v1015_v25 }
  0x41   :  { %353 = vmatpush.msrb.mxu0 %v1094_v56  ;;  %519 = vmatpush.msrb.mxu3 %v1153_v34 }
  0x42   :  { %398 = vmatpush.msrb.mxu1 %v980_v11  ;;  %442 = vmatpush.msrb.mxu2 %v1035_v32 }
  0x43   :  { %357 = vmatpush.msrb.mxu0 %v1110_v62  ;;  %525 = vmatpush.msrb.mxu3 %v1167_v42 }
  0x44   :  { %400 = vmatpush.msrb.mxu1 %v993_v17  ;;  %444 = vmatpush.msrb.mxu2 %v1065_v45 }
  0x45   :  { %361 = vmatpush.msrb.mxu0 %v1126_v7  ;;  %531 = vmatpush.msrb.mxu3 %v1181_v54 }
  0x46   :  { %402 = vmatpush.msrb.mxu1 %v1015_v25  ;;  %446 = vmatpush.msrb.mxu2 %v1067_v46 }
  0x47   :  { %365 = vmatpush.msrb.mxu0 %v1144_v30  ;;  %537 = vmatpush.msrb.mxu3 %v1192_v1 }
  0x48   :  { %404 = vmatpush.msrb.mxu1 %v1035_v32  ;;  %448 = vmatpush.msrb.mxu2 %v1083_v52 }
  0x49   :  { %369 = vmatpush.msrb.mxu0 %v1158_v38  ;;  %543 = vmatpush.msrb.mxu3 %v1203_v35 }
  0x4a   :  { %406 = vmatpush.msrb.mxu1 %v1065_v45  ;;  %450 = vmatpush.msrb.mxu2 %v1099_v58 }
  0x4b   :  { %373 = vmatpush.msrb.mxu0 %v1172_v48  ;;  %549 = vmatpush.msrb.mxu3 %v1211_v8 }
  0x4c   :  { %408 = vmatpush.msrb.mxu1 %v1067_v46  ;;  %452 = vmatpush.msrb.mxu2 %v1115_v0 }
  0x4d   :  { %377 = vmatpush.msrb.mxu0 %v1186_v61  ;;  %555 = vmatpush.msrb.mxu3 %v1219_v60 }
  0x4e   :  { %410 = vmatpush.msrb.mxu1 %v1083_v52  ;;  %454 = vmatpush.msrb.mxu2 %v1131_v12 }
  0x4f   :  { %275 = vmatmul.f32.vlgmr.msra.gmra.mxu2 %v116_v49  ;;  %381 = vmatpush.msrb.mxu0 %v1197_v29 }
  0x50   :  { %412 = vmatpush.msrb.mxu1 %v1099_v58  ;;  %456 = vmatpush.msrb.mxu2 %v1135_v13 }
  0x51   :  { %120 = vmatmul.f32.vlgmr.msra.gmra.mxu0 %v119_v63  ;;  %314 = vmatmul.f32.vlgmr.msra.gmra.mxu3 %v117_v55 }
  0x52   :  { %414 = vmatpush.msrb.mxu1 %v1115_v0  ;;  %569 = vmatpush.msra.mxu0 %v984_v14  ;;  %v1309_v14 = vand.u32 4294901760, %v424_v2 }
  0x53   :  { %663 = vmatpush.msra.mxu2 %v1007_v22  ;;  %561 = vmatpush.msrb.mxu3 %v1225_v6 }
  0x54   :  { %416 = vmatpush.msrb.mxu1 %v1131_v12  ;;  %572 = vmatpush.msra.mxu0 %v987_v15 }
  0x55   :  { %221 = vmatmul.f32.vlgmr.msra.gmra.mxu1 %v1252_v43  ;;  %667 = vmatpush.msra.mxu2 %v1010_v23 }
  0x56   :  { %730 = vmatpush.msra.mxu3 %v970_v3  ;;  %418 = vmatpush.msrb.mxu1 %v1135_v13 }
  0x57   :  { %575 = vmatpush.msra.mxu0 %v991_v16  ;;  %671 = vmatpush.msra.mxu2 %v1013_v24 }
  0x58   :  { %622 = vmatpush.msra.mxu1 %v970_v3  ;;  %732 = vmatpush.msra.mxu3 %v972_v4  ;;  %v458_v3 = vsub.f32 %v424_v2, %v1309_v14 }
  0x59   :  { %578 = vmatpush.msra.mxu0 %v996_v18  ;;  %675 = vmatpush.msra.mxu2 %v1019_v26 }
  0x5a   :  { %624 = vmatpush.msra.mxu1 %v972_v4  ;;  %734 = vmatpush.msra.mxu3 %v974_v5  ;;  %v459_v4 = vand.u32 4294901760, %v458_v3 }
  0x5b   :  { %383 = vmatmul.f32.vlgmr.msrb.gmra.mxu0 %v1252_v43  ;;  %679 = vmatpush.msra.mxu2 %v1022_v27 }
  0x5c   :  { %626 = vmatpush.msra.mxu1 %v974_v5  ;;  %581 = vmatpush.msra.mxu0 %v999_v19  ;;  %v460_v5 = vsub.f32 %v458_v3, %v459_v4 }
  0x5d   :  { %736 = vmatpush.msra.mxu3 %v976_v9  ;;  %420 = vmatmul.f32.vlgmr.msrb.gmra.mxu1 %v1252_v43 }
  0x5e   :  { %584 = vmatpush.msra.mxu0 %v1002_v20  ;;  %628 = vmatpush.msra.mxu1 %v976_v9  ;;  %v461_v9 = vand.u32 4294901760, %v460_v5 }
  0x5f   :  { %683 = vmatpush.msra.mxu2 %v1039_v33  ;;  %738 = vmatpush.msra.mxu3 %v978_v10 }
  0x60   :  { %587 = vmatpush.msra.mxu0 %v1025_v28  ;;  %630 = vmatpush.msra.mxu1 %v978_v10  ;;  %v1392_v10 = vld [vmem:[#allocation12_spill] sm:$0xff] }
  0x61   :  { %687 = vmatpush.msra.mxu2 %v1056_v41  ;;  %740 = vmatpush.msra.mxu3 %v980_v11 }
  0x62   :  { %590 = vmatpush.msra.mxu0 %v1050_v39  ;;  %632 = vmatpush.msra.mxu1 %v980_v11  ;;  %v1393_v11 = vld [vmem:[#allocation13_spill] sm:$0xff] }
  0x63   :  { %691 = vmatpush.msra.mxu2 %v1078_v50  ;;  %742 = vmatpush.msra.mxu3 %v993_v17 }
  0x64   :  { %593 = vmatpush.msra.mxu0 %v1063_v44  ;;  %634 = vmatpush.msra.mxu1 %v993_v17 }
  0x65   :  { %695 = vmatpush.msra.mxu2 %v1094_v56  ;;  %744 = vmatpush.msra.mxu3 %v1015_v25 }
  0x66   :  { %596 = vmatpush.msra.mxu0 %v1081_v51  ;;  %636 = vmatpush.msra.mxu1 %v1015_v25 }
  0x67   :  { %699 = vmatpush.msra.mxu2 %v1110_v62  ;;  %746 = vmatpush.msra.mxu3 %v1035_v32 }
  0x68   :  { %599 = vmatpush.msra.mxu0 %v1097_v57  ;;  %638 = vmatpush.msra.mxu1 %v1035_v32 }
  0x69   :  { %703 = vmatpush.msra.mxu2 %v1126_v7  ;;  %748 = vmatpush.msra.mxu3 %v1065_v45 }
  0x6a   :  { %602 = vmatpush.msra.mxu0 %v1392_v10  ;;  %640 = vmatpush.msra.mxu1 %v1065_v45 }
  0x6b   :  { %707 = vmatpush.msra.mxu2 %v1144_v30  ;;  %750 = vmatpush.msra.mxu3 %v1067_v46 }
  0x6c   :  { %462 = vmatmul.f32.vlgmr.msrb.gmra.mxu2 %v461_v9  ;;  %563 = vmatmul.f32.vlgmr.msrb.gmra.mxu3 %v1309_v14 }
  0x6d   :  { %605 = vmatpush.msra.mxu0 %v1393_v11  ;;  %642 = vmatpush.msra.mxu1 %v1067_v46 }
  0x6e   :  { %711 = vmatpush.msra.mxu2 %v1158_v38  ;;  %752 = vmatpush.msra.mxu3 %v1083_v52  ;;  %v820_v38 = vld [vmem:[%s1385_s3] ss:$0 sm:$0xff] }
  0x6f   :  { %608 = vmatpush.msra.mxu0 %v1147_v31  ;;  %644 = vmatpush.msra.mxu1 %v1083_v52 }
  0x70   :  { %715 = vmatpush.msra.mxu2 %v1172_v48  ;;  %754 = vmatpush.msra.mxu3 %v1099_v58 }
  0x71   :  { %611 = vmatpush.msra.mxu0 %v1161_v40  ;;  %646 = vmatpush.msra.mxu1 %v1099_v58 }
  0x72   :  { %719 = vmatpush.msra.mxu2 %v1186_v61  ;;  %756 = vmatpush.msra.mxu3 %v1115_v0 }
  0x73   :  { %614 = vmatpush.msra.mxu0 %v1175_v53  ;;  %648 = vmatpush.msra.mxu1 %v1115_v0 }
  0x74   :  { %723 = vmatpush.msra.mxu2 %v1197_v29  ;;  %758 = vmatpush.msra.mxu3 %v1131_v12 }
  0x75   :  { %617 = vmatmul.f32.vlgmr.msra.gmra.mxu0 %v458_v3  ;;  %725 = vmatmul.f32.vlgmr.msra.gmra.mxu2 %v1309_v14 }
  0x76   :  { %650 = vmatpush.msra.mxu1 %v1131_v12  ;;  %760 = vmatpush.msra.mxu3 %v1135_v13 }
  0x77   :  { %762 = vmatmul.f32.vlgmr.msra.gmra.mxu3 %v1309_v14 }
  0x78   :  { %652 = vmatpush.msra.mxu1 %v1135_v13 }
  0x79   :  { %656 = vmatmul.f32.vlgmr.msra.gmra.mxu1 %v459_v4 }
  0xce   :  { %v121_v15 = vpop.f32.mrf.mxu0 }
  0xd2   :  { %v222_v16 = vpop.f32.mrf.mxu1  ;;  %v276_v18 = vpop.f32.mrf.mxu2 }
  0xd3   :  { %v223_v17 = vadd.f32 %v222_v16, %v121_v15 }
  0xd4   :  { %v315_v19 = vpop.f32.mrf.mxu3 }
  0xd5   :  { %v277_v20 = vadd.f32 %v276_v18, %v223_v17 }
  0xd7   :  { %v316_v23 = vadd.f32 %v315_v19, %v277_v20 }
  0xd8   :  { %v384_v22 = vpop.f32.mrf.mxu0 }
  0xd9   :  { %v385_v27 = vadd.f32 %v384_v22, %v316_v23 }
  0xda   :  { %v421_v24 = vpop.f32.mrf.mxu1 }
  0xdb   :  { %v422_v33 = vadd.f32 %v421_v24, %v385_v27 }
  0xdd   :  { %v766_v46 = vmul.f32 0.03125, %v422_v33 }
  0xdf   :  { %v768_v56 = vmul.f32 %v766_v46, %v766_v46 }
  0xef   :  { %v463_v25 = vpop.f32.mrf.mxu2  ;;  %v564_v26 = vpop.f32.mrf.mxu3 }
  0xf0   :  { %v565_v28 = vadd.f32 %v564_v26, %v463_v25 }
  0xf2   :  { %v618_v32 = vpop.f32.mrf.mxu0 }
  0xf3   :  { %v619_v39 = vadd.f32 %v618_v32, %v565_v28 }
  0xf6   :  { %v657_v41 = vpop.f32.mrf.mxu1 }
  0xf7   :  { %v658_v44 = vadd.f32 %v657_v41, %v619_v39 }
  0xf8   :  { %v726_v45 = vpop.f32.mrf.mxu2 }
  0xf9   :  { %v727_v50 = vadd.f32 %v726_v45, %v658_v44 }
  0xfa   :  { %v763_v51 = vpop.f32.mrf.mxu3 }
  0xfb   :  { %v764_v52 = vadd.f32 %v763_v51, %v727_v50 }
  0xfd   :  { %v767_v57 = vmul.f32 0.03125, %v764_v52 }
  0xff   :  { %v769_v58 = vsub.f32 %v767_v57, %v768_v56 }
 0x101   :  { %v770_v62 = vadd.f32 1e-05, %v769_v58 }
 0x103   :  { %821 = vrsqrt.f32 %v770_v62  ;;  %vm777_vm1 = vweird.f32 %v770_v62 }
 0x109   :  { %v822_v0 = vpop.eup %821 }
 0x10a   :  { %v772_v7 = vmul.f32 %v822_v0, %v770_v62  ;;  %vm778_vm0 = vweird.f32 %v822_v0 }
 0x10b   :  { %vm779_vm2 = vmor %vm777_vm1, %vm778_vm0 }
 0x10c   :  { %v773_v8 = vmul.f32 %v822_v0, %v772_v7 }
 0x10e   :  { %v774_v12 = vmul.f32 0.5, %v773_v8 }
 0x110   :  { %v775_v13 = vsub.f32 1.5, %v774_v12 }
 0x112   :  { %v776_v30 = vmul.f32 %v822_v0, %v775_v13 }
 0x114   :  { %v780_v31 = vsel %vm779_vm2, %v822_v0, %v776_v30 }
 0x115   :  { %v785_v34 = vmul.f32 %v819_v21, %v780_v31 }
 0x117   :  { %v787_v40 = vmul.f32 %v785_v34, %v766_v46  ;;  %v792_v48 = vmul.f32 %v785_v34, %v1241_v37 }
 0x119   :  { %v791_v42 = vsub.f32 %v820_v38, %v787_v40 }
 0x11b   :  { %v793_v53 = vadd.f32 %v792_v48, %v791_v42 }
 0x11d   :  { %794 = vst [vmem:[#allocation8] sm:$0xff] %v793_v53 }
 0x11e   :  { %805 = dma.vmem_to_hbm [thread:$0]  %s801_s12, 128, %s803_s15, [#allocation4]  }
 0x11f   :  { %923 = dma.done.wait [#allocation4], 128  }
 0x120   :  { %924 = vsyncadd [#allocation4], 4294967168 }
 0x121   :  { %810 = vsyncpa [#allocation3], 1 }
 0x122   :  { %811 = vsyncpa [#allocation6], 1 }
 0x123   :  { %812 = vsyncpa [#allocation4], 1 }

</bundles_post_ra>
